<compile_context>
chip_gen: v5e
topology: v5e:2x2
jax: 0.10.0
libtpu: 0.0.40
codegen_flags: <defaults>
</compile_context>

<pallas_src>
import functools

import jax
import jax.numpy as jnp
from jax import lax
from jax.experimental import pallas as pl
from jax.experimental.pallas import tpu as pltpu

LANE = 128
DEFAULT_TILE_ROWS = 2048            # 2048 x 128 x 4B = 1 MiB per f32 block

# lowbias32 constants (expressed as signed int32) for the off-TPU fallback RNG.
_MIX_C1 = 0x7FEB352D
_MIX_C2 = 0x846CA68B - (1 << 32)


def _shr(v, n):
    return lax.shift_right_logical(v, jnp.int32(n))


def _mix_full(v):
    """Full lowbias32 finalizer — used for the per-tile seed on the scalar unit."""
    v = v ^ _shr(v, 16)
    v = v * jnp.int32(_MIX_C1)
    v = v ^ _shr(v, 15)
    v = v * jnp.int32(_MIX_C2)
    v = v ^ _shr(v, 16)
    return v


def _mix_lite(v):
    """One-round-lighter mix for the vector fallback path (dropout-quality)."""
    v = v * jnp.int32(_MIX_C1)
    v = v ^ _shr(v, 15)
    v = v * jnp.int32(_MIX_C2)
    v = v ^ _shr(v, 16)
    return v


def _dropout_kernel(seed_ref, x_ref, o_ref, *, thr, scale, use_hw_prng):
    shape = x_ref.shape                       # (tile_rows, LANE), static

    if use_hw_prng:
        # Hardware PRNG: ~1-2 ops/vreg; distinct stream per grid step.
        pltpu.prng_seed(seed_ref[0] + pl.program_id(0))
        bits = pltpu.prng_random_bits(shape)
        if bits.dtype != jnp.int32:
            bits = pltpu.bitcast(bits, jnp.int32)
    else:
        # Off-TPU / interpret fallback: counter-based hash.  Per-tile seed is
        # mixed on the (free) scalar unit; the element-index iota is
        # grid-loop-invariant so the compiler can hoist it.
        tile_seed = _mix_full(seed_ref[0] ^ pl.program_id(0))
        r = lax.broadcasted_iota(jnp.int32, shape, 0)
        c = lax.broadcasted_iota(jnp.int32, shape, 1)
        bits = _mix_lite((r * jnp.int32(shape[1]) + c) ^ tile_seed)

    # bits is uniform over all 32-bit patterns; drop iff signed(bits) < p*2^32 - 2^31
    # (equivalent to an unsigned compare against p * 2^32).
    drop = bits < jnp.int32(thr)

    # Native-dtype select + scale (no f32 upcast); survivors become x / (1 - p).
    x = x_ref[...]
    o_ref[...] = jnp.where(drop, jnp.zeros((), x.dtype),
                           x * jnp.asarray(scale, x.dtype))


def _round_up(n, m):
    return ((n + m - 1) // m) * m


def _choose_tile_rows(rows, tile_rows):
    if rows <= 16:
        return rows                    # single block == full extent
    # Aim for >=2 grid steps (megacore split on v7x) with row counts that are
    # multiples of 16 (covers bf16 (16,128) sublane packing); never exceed the
    # requested tile size.
    tr = min(tile_rows, _round_up(pl.cdiv(rows, 2), 16))
    return max(16, tr)


def _on_tpu_backend():
    try:
        return jax.devices()[0].platform == "tpu"
    except Exception:
        return False


def my_dropout(x, p, seed, training=True,
               tile_rows=DEFAULT_TILE_ROWS, use_hw_prng=None):
    """Functional equivalent of MyDropout(p).forward(x) with module.training=training."""
    assert 0.0 <= p <= 1.0
    if (not training) or p <= 0.0001:      # same gate as the PyTorch module
        return x
    if p >= 1.0:                           # degenerate case: everything dropped
        return jnp.zeros_like(x)
    if use_hw_prng is None:
        use_hw_prng = _on_tpu_backend()

    orig_shape = x.shape
    total = 1
    for d in orig_shape:
        total *= d
    if total == 0:
        return x

    scale = 1.0 / (1.0 - p)
    # Pre-biased signed threshold: drop iff int32(bits) < p*2^32 - 2^31.
    thr = int(round(p * float(1 << 32))) - (1 << 31)
    thr = max(-(1 << 31), min(thr, (1 << 31) - 1))

    x_flat = jnp.reshape(x, (total,))
    rem = total % LANE
    aligned = total - rem

    parts = []
    if aligned:
        rows = aligned // LANE
        prefix = x_flat if rem == 0 else x_flat[:aligned]
        x2d = jnp.reshape(prefix, (rows, LANE))

        tr = _choose_tile_rows(rows, tile_rows)
        grid = (pl.cdiv(rows, tr),)
        kernel = functools.partial(
            _dropout_kernel, thr=thr, scale=scale, use_hw_prng=use_hw_prng)
        seed_arr = jnp.asarray([seed], dtype=jnp.int32)

        out2d = pl.pallas_call(
            kernel,
            grid=grid,
            in_specs=[
                pl.BlockSpec(memory_space=pltpu.SMEM),         # seed scalar
                pl.BlockSpec((tr, LANE), lambda i: (i, 0)),    # x tile
            ],
            out_specs=pl.BlockSpec((tr, LANE), lambda i: (i, 0)),
            out_shape=jax.ShapeDtypeStruct((rows, LANE), x.dtype),
            compiler_params=pltpu.CompilerParams(
                dimension_semantics=("parallel",),   # shard grid across TCs (v7x)
                # ~4 MiB double-buffered in+out at the default tile; stated
                # explicitly so the buffering survives on v7x's smaller VMEM.
                vmem_limit_bytes=32 * 1024 * 1024,
            ),
        )(seed_arr, x2d)
        parts.append(jnp.reshape(out2d, (aligned,)))

    if rem:
        # <128-element tail handled in plain JAX: cheaper than padding and
        # slicing the whole tensor through HBM just to align the kernel shape.
        tail = x_flat[aligned:]
        tail_key = jax.random.fold_in(jax.random.PRNGKey(seed), total)
        tail_drop = jax.random.uniform(tail_key, (rem,), jnp.float32) < p
        parts.append(jnp.where(tail_drop, jnp.zeros((), x.dtype),
                               tail * jnp.asarray(scale, x.dtype)).astype(x.dtype))

    out_flat = parts[0] if len(parts) == 1 else jnp.concatenate(parts)
    return jnp.reshape(out_flat, orig_shape)


if __name__ == "__main__":
    key = jax.random.PRNGKey(0)
    x = jax.random.normal(key, (2, 4, 16, 16), dtype=jnp.float32)
    p = 0.3

    y = jax.block_until_ready(my_dropout(x, p=p, seed=1234, training=True))

    # Dropout semantics: shape/dtype preserved, survivors are exactly x/(1-p),
    # a plausible fraction of elements dropped.
    assert y.shape == x.shape and y.dtype == x.dtype
    survive = y != 0.0
    expected = x * (1.0 / (1.0 - p))
    max_err = jnp.max(jnp.abs(jnp.where(survive, y - expected, 0.0)))
    drop_frac = 1.0 - jnp.mean(survive.astype(jnp.float32))
    assert float(max_err) < 1e-5, f"surviving elements mis-scaled: {max_err}"
    assert 0.1 < float(drop_frac) < 0.5, f"drop fraction implausible: {drop_frac}"

    # Eval mode (training=False) must be the identity.
    y_eval = jax.block_until_ready(my_dropout(x, p=p, seed=1234, training=False))
    assert jnp.array_equal(y_eval, x)

    # bf16 native-dtype path smoke test.
    y_bf16 = jax.block_until_ready(my_dropout(x.astype(jnp.bfloat16), p=p, seed=7))
    assert y_bf16.shape == x.shape and y_bf16.dtype == jnp.bfloat16

    # Non-128-aligned size: kernel on the aligned prefix + plain-JAX tail.
    xr = jax.random.normal(jax.random.PRNGKey(1), (17, 129), dtype=jnp.float32)
    yr = jax.block_until_ready(my_dropout(xr, p=p, seed=99))
    sr = yr != 0.0
    err_r = jnp.max(jnp.abs(jnp.where(sr, yr - xr * (1.0 / (1.0 - p)), 0.0)))
    assert yr.shape == xr.shape and float(err_r) < 1e-5

    print("KERNEL_OK")
</pallas_src>

<mosaic_0001>
module attributes {stable_mosaic.version = 11 : i64} {
  func.func @_dropout_kernel(%arg0: i32, %arg1: memref<1xi32, #tpu.memory_space<smem>>, %arg2: memref<16x128xf32, #tpu.memory_space<vmem>>, %arg3: memref<16x128xf32, #tpu.memory_space<vmem>>) attributes {dimension_semantics = [#tpu.dimension_semantics<parallel>], iteration_bounds = array<i64: 1>, scalar_prefetch = 0 : i64, scratch_operands = 0 : i64, tpu.core_type = #tpu.core_type<tc>, window_params = [{transform_indices = @transform_0, window_bounds = array<i64: 1>}, {transform_indices = @transform_1, window_bounds = array<i64: 16, 128>}, {transform_indices = @transform_2, window_bounds = array<i64: 16, 128>}]} {
    %c0 = arith.constant 0 : index
    %0 = memref.load %arg1[%c0] : memref<1xi32, #tpu.memory_space<smem>>
    %1 = arith.xori %0, %arg0 : i32
    %c16_i32 = arith.constant 16 : i32
    %2 = arith.shrui %1, %c16_i32 : i32
    %3 = arith.xori %1, %2 : i32
    %c2146121005_i32 = arith.constant 2146121005 : i32
    %4 = arith.muli %3, %c2146121005_i32 : i32
    %c15_i32 = arith.constant 15 : i32
    %5 = arith.shrui %4, %c15_i32 : i32
    %6 = arith.xori %4, %5 : i32
    %c-2073254261_i32 = arith.constant -2073254261 : i32
    %7 = arith.muli %6, %c-2073254261_i32 : i32
    %c16_i32_0 = arith.constant 16 : i32
    %8 = arith.shrui %7, %c16_i32_0 : i32
    %9 = arith.xori %7, %8 : i32
    %10 = tpu.iota {dimensions = array<i32: 0>} : vector<16x128xi32>
    %11 = tpu.iota {dimensions = array<i32: 1>} : vector<16x128xi32>
    %c128_i32 = arith.constant 128 : i32
    %12 = vector.broadcast %c128_i32 : i32 to vector<16x128xi32>
    %13 = arith.muli %10, %12 : vector<16x128xi32>
    %14 = arith.addi %13, %11 : vector<16x128xi32>
    %15 = vector.broadcast %9 : i32 to vector<16x128xi32>
    %16 = arith.xori %14, %15 : vector<16x128xi32>
    %c2146121005_i32_1 = arith.constant 2146121005 : i32
    %17 = vector.broadcast %c2146121005_i32_1 : i32 to vector<16x128xi32>
    %18 = arith.muli %16, %17 : vector<16x128xi32>
    %c15_i32_2 = arith.constant 15 : i32
    %19 = vector.broadcast %c15_i32_2 : i32 to vector<16x128xi32>
    %20 = arith.shrui %18, %19 : vector<16x128xi32>
    %21 = arith.xori %18, %20 : vector<16x128xi32>
    %c-2073254261_i32_3 = arith.constant -2073254261 : i32
    %22 = vector.broadcast %c-2073254261_i32_3 : i32 to vector<16x128xi32>
    %23 = arith.muli %21, %22 : vector<16x128xi32>
    %c16_i32_4 = arith.constant 16 : i32
    %24 = vector.broadcast %c16_i32_4 : i32 to vector<16x128xi32>
    %25 = arith.shrui %23, %24 : vector<16x128xi32>
    %26 = arith.xori %23, %25 : vector<16x128xi32>
    %c-858993459_i32 = arith.constant -858993459 : i32
    %27 = vector.broadcast %c-858993459_i32 : i32 to vector<16x128xi32>
    %28 = arith.cmpi slt, %26, %27 : vector<16x128xi32>
    %c0_5 = arith.constant 0 : index
    %c0_6 = arith.constant 0 : index
    %29 = vector.load %arg2[%c0_5, %c0_6] : memref<16x128xf32, #tpu.memory_space<vmem>>, vector<16x128xf32>
    %cst = arith.constant 1.42857146 : f32
    %30 = vector.broadcast %cst : f32 to vector<16x128xf32>
    %31 = arith.mulf %29, %30 : vector<16x128xf32>
    %cst_7 = arith.constant 0.000000e+00 : f32
    %32 = vector.broadcast %cst_7 : f32 to vector<16x128xf32>
    %33 = arith.select %28, %32, %31 : vector<16x128xi1>, vector<16x128xf32>
    %c0_8 = arith.constant 0 : index
    %c0_9 = arith.constant 0 : index
    %34 = vector.load %arg3[%c0_8, %c0_9] : memref<16x128xf32, #tpu.memory_space<vmem>>, vector<16x128xf32>
    tpu.vector_store %arg3[%c0_8, %c0_9], %33 {strides = array<i32>} : memref<16x128xf32, #tpu.memory_space<vmem>>, vector<16x128xf32>,
    return
  }
  func.func @transform_0(%arg0: i32) -> i32 {
    %c0_i32 = arith.constant 0 : i32
    %c0_i32_0 = arith.constant 0 : i32
    return %c0_i32 : i32
  }
  func.func @transform_1(%arg0: i32) -> (i32, i32) {
    %c0_i32 = arith.constant 0 : i32
    %c0_i32_0 = arith.constant 0 : i32
    return %arg0, %c0_i32 : i32, i32
  }
  func.func @transform_2(%arg0: i32) -> (i32, i32) {
    %c0_i32 = arith.constant 0 : i32
    %c0_i32_0 = arith.constant 0 : i32
    return %arg0, %c0_i32 : i32, i32
  }
}

</mosaic_0001>

<bundles_post_ra>
// kernel: tpu_custom_call.1
= control target key start
LH: loop header
LB: loop body
LE: loop exit
PB: predicated region body
PF: predicated region fallthrough
CT: control target
= control target key end

     0   :  { %8 = vsyncpa [#allocation4], 0  ;;  %s185_s0 = inlined_call_operand.<no memory space> [shape: s32[1], index: 0, kind: input, shape index: {}]   ;;  %s186_s1 = inlined_call_operand.hbm [shape: f32[16,128], index: 1, kind: input, shape index: {}]   ;;  %s187_s2 = inlined_call_operand.hbm [shape: f32[16,128], index: 2, kind: output, shape index: {}]  }
   0x1   :  { %9 = vsyncpa [#allocation5], 0  ;;  %s16_s11 = sshll.u32 %s186_s1, 4  ;;  %s148_s12 = smov [#allocation3]   ;;  %s17_s11 = int_to_ptr.hbm [resolvable:$true] %s16_s11 }
   0x2   :  { %s18_s13 = sshll.u32 %s148_s12, 4  ;;  %s149_s14 = smov 128   ;;  %s19_s13 = int_to_ptr.vmem [resolvable:$true] %s18_s13 }
   0x3   :  { %s150_s15 = smov 8  }
   0x4   :  { %24 = dma.hbm_to_vmem [thread:$0]  %s17_s11, 256, %s19_s13, [#allocation4], %s149_s14, %s149_s14, %s150_s15  }
   0x5   :  { %144 = dma.done.wait [#allocation4], 256  }
   0x6   :  { %145 = vsyncadd [#allocation4], 4294967040  ;;  %s31_s18 = sshrl.u32 %s185_s0, 16  ;;  %v39_v0 = vlaneseq  ;;  %v65_v18 = vld [vmem:[#allocation3] sm:$0xff]  ;;  %v66_v20 = vld [vmem:[#allocation3 + $0x8] sm:$0xff]  ;;  %s79_s30 = sshll.u32 %s187_s2, 4  ;;  %s80_s30 = int_to_ptr.hbm [resolvable:$true] %s79_s30 }
   0x7   :  { %s32_s1 = sxor.u32 %s31_s18, %s185_s0  ;;  %v67_v23 = vmul.f32 1.4285715, %v65_v18  ;;  %v68_v24 = vmul.f32 1.4285715, %v66_v20  ;;  %s151_s0 = smov [#allocation6]  }
   0x8   :  { %s33_s21 = smul.u32 2146121005, %s32_s1  ;;  %v40_v1 = vshrl.u32 %v39_v0, 7  ;;  %v43_v2 = vand.u32 127, %v39_v0  ;;  %s77_s27 = sshll.u32 %s151_s0, 4  ;;  %s78_s27 = int_to_ptr.vmem [resolvable:$true] %s77_s27 }
   0xa   :  { %s34_s22 = sshrl.u32 %s33_s21, 15  ;;  %v44_v3 = vmul.u32 128, %v40_v1  ;;  %v41_v4 = vadd.s32 8, %v40_v1 }
   0xb   :  { %s35_s23 = sxor.u32 %s34_s22, %s33_s21 }
   0xc   :  { %s36_s24 = smul.u32 2221713035, %s35_s23  ;;  %v45_v5 = vmul.u32 128, %v41_v4  ;;  %v46_v6 = vadd.s32 %v44_v3, %v43_v2 }
   0xe   :  { %s37_s25 = sshrl.u32 %s36_s24, 16  ;;  %v47_v7 = vadd.s32 %v45_v5, %v43_v2 }
   0xf   :  { %s38_s26 = sxor.u32 %s37_s25, %s36_s24 }
  0x10   :  { %v48_v8 = vstv %s38_s26 }
  0x11   :  { %v49_v9 = vxor.u32 %v48_v8, %v46_v6  ;;  %v50_v10 = vxor.u32 %v48_v8, %v47_v7 }
  0x13   :  { %v51_v11 = vmul.u32 2146121005, %v49_v9  ;;  %v52_v12 = vmul.u32 2146121005, %v50_v10 }
  0x15   :  { %v53_v13 = vshrl.u32 %v51_v11, 15  ;;  %v54_v14 = vshrl.u32 %v52_v12, 15 }
  0x17   :  { %v55_v15 = vxor.u32 %v53_v13, %v51_v11  ;;  %v56_v16 = vxor.u32 %v54_v14, %v52_v12 }
  0x19   :  { %v57_v17 = vmul.u32 2221713035, %v55_v15  ;;  %v58_v19 = vmul.u32 2221713035, %v56_v16 }
  0x1b   :  { %v59_v21 = vshrl.u32 %v57_v17, 16  ;;  %v60_v22 = vshrl.u32 %v58_v19, 16 }
  0x1d   :  { %v61_v25 = vxor.u32 %v59_v21, %v57_v17  ;;  %v62_v26 = vxor.u32 %v60_v22, %v58_v19 }
  0x1f   :  { %vm63_vm0 = vcmp.lt.s32.totalorder %v61_v25, 3435973837  ;;  %vm64_vm1 = vcmp.lt.s32.totalorder %v62_v26, 3435973837 }
  0x20   :  { %v69_v27 = vsel %vm63_vm0, 0.0, %v67_v23  ;;  %v70_v28 = vsel %vm64_vm1, 0.0, %v68_v24 }
  0x21   :  { %71 = vst [vmem:[#allocation6] sm:$0xff] %v69_v27 }
  0x22   :  { %72 = vst [vmem:[#allocation6 + $0x8] sm:$0xff] %v70_v28 }
  0x23   :  { %85 = dma.vmem_to_hbm [thread:$0]  %s78_s27, 256, %s80_s30, [#allocation5], %s149_s14, %s149_s14, %s150_s15  }
  0x24   :  { %146 = dma.done.wait [#allocation5], 256  }
  0x25   :  { %147 = vsyncadd [#allocation5], 4294967040 }
  0x26   :  { %90 = vsyncpa [#allocation4], 1 }
  0x27   :  { %91 = vsyncpa [#allocation5], 1 }

</bundles_post_ra>
